<compile_context>
chip_gen: v5e
topology: v5e:2x2
jax: 0.10.0
libtpu: 0.0.40
codegen_flags: <defaults>
</compile_context>

<pallas_src>
import jax
import jax.numpy as jnp
from jax.experimental import pallas as pl
from jax.experimental.pallas import tpu as pltpu

BN_EPS = 1e-5


def _round_up(x, m):
    return ((x + m - 1) // m) * m


# ---------------------------------------------------------------------------
# Kernel: one batch tile, batch on the lane axis.
# ---------------------------------------------------------------------------
def dsb_kernel(nc_ref, ci_ref, w1n_ref, w1c_ref, b1_ref, w2_ref, b2_ref,
               wh_ref, bh_ref, out_ref):
    # nc_ref : [n_nc, TB]      f32   non-categorical features (batch on lanes)
    # ci_ref : [n_feat, TB]    int32 globally-offset category ids
    # w1n_ref: [150, n_nc]     f32   (BN1 folded)      b1_ref: [150, 1] f32
    # w1c_ref: [150, C_total]  f32   (emb tables folded through lin1 + BN1)
    # w2_ref : [50, 150]       bf16  (BN2 folded)      b2_ref: [50, 1]  f32
    # wh_ref : [2, 50]         bf16  (fused heads)     bh_ref: [2, 1]   f32
    # out_ref: [2, TB]         f32   row 0 = clamp(relu(regr),0,1), row 1 = sigmoid(bin)
    nc = nc_ref[...]
    idx = ci_ref[...]
    n_feat, tb = idx.shape
    c_total = w1c_ref.shape[1]

    # Fused embedding lookup: combined one-hot over disjoint global id ranges.
    row = jax.lax.broadcasted_iota(jnp.int32, (c_total, tb), 0)
    oh = (row == idx[0:1, :]).astype(jnp.float32)
    for j in range(1, n_feat):                      # static, tiny loop (#cat features)
        oh = oh + (row == idx[j:j + 1, :]).astype(jnp.float32)

    # layer 1 (lin1 + BN1 + ReLU), kept in f32: K is tiny so MXU cost is negligible
    h1 = (jnp.dot(w1n_ref[...], nc, preferred_element_type=jnp.float32)
          + jnp.dot(w1c_ref[...], oh, preferred_element_type=jnp.float32)
          + b1_ref[...])
    h1 = jnp.maximum(h1, 0.0).astype(jnp.bfloat16)                    # [150, TB]

    # layer 2 (lin2 + BN2 + ReLU)
    h2 = jnp.dot(w2_ref[...], h1, preferred_element_type=jnp.float32) + b2_ref[...]
    h2 = jnp.maximum(h2, 0.0).astype(jnp.bfloat16)                    # [50, TB]

    # fused heads
    heads = (jnp.dot(wh_ref[...], h2, preferred_element_type=jnp.float32)
             + bh_ref[...])                                           # [2, TB]

    # row 0: relu + clamp(0,1) == clip(.,0,1); row 1: sigmoid via EUP exp + recip
    sig = pl.reciprocal(1.0 + jnp.exp(-heads), approx=True)
    rsel = jax.lax.broadcasted_iota(jnp.int32, heads.shape, 0)
    out_ref[...] = jnp.where(rsel == 0, jnp.clip(heads, 0.0, 1.0), sig)


# ---------------------------------------------------------------------------
# Wrapper
# ---------------------------------------------------------------------------
def _fold_bn(w, b, gamma, beta, mean, var):
    """Fold an eval-mode BatchNorm1d into the preceding Linear.

    w: [in, out]; b/gamma/beta/mean/var: [1, out].
    """
    scale = gamma * jax.lax.rsqrt(var + BN_EPS)           # [1, out]
    return w * scale, (b - mean) * scale + beta


def dsb_forward(non_cat, cat, params, *, tile_b=4096):
    """non_cat: [B, n_non_cat] f32, cat: [B, n_cat_features] int32."""
    B, n_nc = non_cat.shape
    n_feat = cat.shape[1]

    # ---- fold eval-mode BatchNorms into the linear layers ----
    w1f, b1f = _fold_bn(params["w1"], params["b1"], params["bn1_g"], params["bn1_b"],
                        params["bn1_m"], params["bn1_v"])          # [D,150], [1,150]
    w2f, b2f = _fold_bn(params["w2"], params["b2"], params["bn2_g"], params["bn2_b"],
                        params["bn2_m"], params["bn2_v"])          # [150,50], [1,50]
    H1, H2 = w1f.shape[1], w2f.shape[1]

    # ---- fold each embedding table through its slice of lin1 (one-hot domain) ----
    w1_nc = w1f[:n_nc]                                    # [n_nc, 150]
    w1_emb = w1f[n_nc:]                                   # [n_emb_out, 150]
    folded, offs = [], []
    e_off, c_off = 0, 0
    for tbl in params["emb_tables"]:
        n_j, d_j = tbl.shape
        folded.append(tbl @ w1_emb[e_off:e_off + d_j])    # [n_j, 150]
        offs.append(c_off)
        e_off += d_j
        c_off += n_j
    w1_cat = jnp.concatenate(folded, axis=0)              # [C_total, 150]
    c_total = c_off

    # ---- batch-on-lane layout; lane tile is the main tuning knob ----
    tb = _round_up(min(tile_b, B), 128)                   # hardened: always mult. of 128
    if B >= 256:
        # keep >= 2 batch tiles so the "parallel" axis can use both v7x TensorCores
        tb = min(tb, _round_up((B + 1) // 2, 128))
    bp = _round_up(B, tb)

    nc_t = jnp.pad(non_cat.astype(jnp.float32).T, ((0, 0), (0, bp - B)))   # [n_nc, Bp]
    cat_g = cat.astype(jnp.int32) + jnp.asarray(offs, jnp.int32)[None, :]
    ci_t = jnp.pad(cat_g.T, ((0, 0), (0, bp - B)))                          # [n_feat, Bp]

    w1n_k = w1_nc.T                                        # [150, n_nc]  f32
    w1c_k = w1_cat.T                                       # [150, C]     f32
    b1_k = b1f.T                                           # [150, 1]     f32
    w2_k = w2f.T.astype(jnp.bfloat16)                      # [50, 150]    bf16
    b2_k = b2f.T                                           # [50, 1]      f32
    wh_k = params["w_heads"].T.astype(jnp.bfloat16)        # [2, 50]      bf16
    bh_k = params["b_heads"].T                             # [2, 1]       f32

    def resident(shape):
        # full-array block, VMEM-resident across all batch tiles
        return pl.BlockSpec(shape, lambda i: (0, 0))

    flops = 2 * bp * (H1 * (n_nc + c_total) + H1 * H2 + H2 * 2)
    bytes_accessed = (bp * (n_nc * 4 + n_feat * 4 + 2 * 4)
                      + 4 * (H1 * (n_nc + c_total + 1) + H2 * (H1 + 1) + 2 * (H2 + 1)))

    out = pl.pallas_call(
        dsb_kernel,
        out_shape=jax.ShapeDtypeStruct((2, bp), jnp.float32),
        grid=(pl.cdiv(bp, tb),),
        in_specs=[
            pl.BlockSpec((n_nc, tb), lambda i: (0, i)),    # non-cat tile (batch on lanes)
            pl.BlockSpec((n_feat, tb), lambda i: (0, i)),  # category-id tile
            resident((H1, n_nc)), resident((H1, c_total)), resident((H1, 1)),
            resident((H2, H1)), resident((H2, 1)),
            resident((2, H2)), resident((2, 1)),
        ],
        out_specs=pl.BlockSpec((2, tb), lambda i: (0, i)),
        compiler_params=pltpu.CompilerParams(
            dimension_semantics=("parallel",),             # batch tiles are independent
            vmem_limit_bytes=32 * 1024 * 1024,             # raise v5e's 16 MiB default
        ),
        cost_estimate=pl.CostEstimate(
            flops=int(flops),
            transcendentals=int(bp),
            bytes_accessed=int(bytes_accessed),
        ),
    )(nc_t, ci_t, w1n_k, w1c_k, b1_k, w2_k, b2_k, wh_k, bh_k)

    return out[0, :B], out[1, :B]                          # matches .view(-1) on each head


# ---------------------------------------------------------------------------
# Parameter init + pure-JAX reference (PyTorch eval-mode semantics, f32)
# ---------------------------------------------------------------------------
def init_params(key, cat_dims, n_non_categorical):
    n_emb_out = sum(d for _, d in cat_dims)
    d_in = n_non_categorical + n_emb_out
    keys = jax.random.split(key, 16)

    def lin(k, fan_in, fan_out):
        kw, kb = jax.random.split(k)
        bound = 1.0 / jnp.sqrt(fan_in)
        w = jax.random.uniform(kw, (fan_in, fan_out), jnp.float32, -bound, bound)
        b = jax.random.uniform(kb, (1, fan_out), jnp.float32, -bound, bound)
        return w, b

    emb_tables = [jax.random.normal(keys[i], (n, d), jnp.float32)
                  for i, (n, d) in enumerate(cat_dims)]

    w1, b1 = lin(keys[8], d_in, 150)
    w2, b2 = lin(keys[9], 150, 50)
    w_reg, b_reg = lin(keys[10], 50, 1)
    w_bin, b_bin = lin(keys[11], 50, 1)

    def bn(k, n):
        kg, kb, km, kv = jax.random.split(k, 4)
        return dict(
            g=jax.random.uniform(kg, (1, n), jnp.float32, 0.5, 1.5),
            b=jax.random.uniform(kb, (1, n), jnp.float32, -0.5, 0.5),
            m=jax.random.uniform(km, (1, n), jnp.float32, -0.5, 0.5),
            v=jax.random.uniform(kv, (1, n), jnp.float32, 0.5, 1.5),
        )

    bn1 = bn(keys[12], 150)
    bn2 = bn(keys[13], 50)

    return dict(
        emb_tables=emb_tables,
        w1=w1, b1=b1, bn1_g=bn1["g"], bn1_b=bn1["b"], bn1_m=bn1["m"], bn1_v=bn1["v"],
        w2=w2, b2=b2, bn2_g=bn2["g"], bn2_b=bn2["b"], bn2_m=bn2["m"], bn2_v=bn2["v"],
        w_heads=jnp.concatenate([w_reg, w_bin], axis=1),      # [50, 2]
        b_heads=jnp.concatenate([b_reg, b_bin], axis=1),      # [1, 2]
    )


def reference_forward(non_cat, cat, params):
    """Pure-JAX f32 reference mirroring the PyTorch module (eval mode)."""
    embs = [jnp.take(t, cat[:, j], axis=0) for j, t in enumerate(params["emb_tables"])]
    x = jnp.concatenate([non_cat] + embs, axis=1)
    h = x @ params["w1"] + params["b1"]
    h = (h - params["bn1_m"]) / jnp.sqrt(params["bn1_v"] + BN_EPS) * params["bn1_g"] + params["bn1_b"]
    h = jnp.maximum(h, 0.0)
    h = h @ params["w2"] + params["b2"]
    h = (h - params["bn2_m"]) / jnp.sqrt(params["bn2_v"] + BN_EPS) * params["bn2_g"] + params["bn2_b"]
    h = jnp.maximum(h, 0.0)
    heads = h @ params["w_heads"] + params["b_heads"]
    regr = jnp.clip(jnp.maximum(heads[:, 0], 0.0), 0.0, 1.0)
    binp = jax.nn.sigmoid(heads[:, 1])
    return regr, binp


if __name__ == "__main__":
    key = jax.random.PRNGKey(0)
    cat_dims = [(10, 4), (7, 3), (5, 6)]     # (num_categories, emb_dim) per categorical feature
    n_non_categorical = 6
    batch = 8

    params = init_params(key, cat_dims, n_non_categorical)

    k_nc, k_cat = jax.random.split(jax.random.PRNGKey(1))
    non_cat = jax.random.normal(k_nc, (batch, n_non_categorical), jnp.float32)
    cat = jnp.stack(
        [jax.random.randint(jax.random.fold_in(k_cat, j), (batch,), 0, n)
         for j, (n, _) in enumerate(cat_dims)], axis=1).astype(jnp.int32)

    regr, binp = dsb_forward(non_cat, cat, params)
    jax.block_until_ready((regr, binp))

    regr_ref, bin_ref = reference_forward(non_cat, cat, params)
    assert regr.shape == (batch,) and binp.shape == (batch,)
    # layer-1 in f32; layers 2/3 use bf16 operands (f32 accumulation) -> loose tolerance
    assert jnp.all(jnp.isfinite(regr)) and jnp.all(jnp.isfinite(binp))
    assert jnp.allclose(regr, regr_ref, atol=3e-2), "regression head mismatch"
    assert jnp.allclose(binp, bin_ref, atol=3e-2), "binary head mismatch"

    print("KERNEL_OK")
</pallas_src>

<mosaic_0001>
module attributes {stable_mosaic.version = 11 : i64} {
  func.func @dsb_kernel(%arg0: i32, %arg1: memref<6x128xf32, #tpu.memory_space<vmem>>, %arg2: memref<3x128xi32, #tpu.memory_space<vmem>>, %arg3: memref<150x6xf32, #tpu.memory_space<vmem>>, %arg4: memref<150x22xf32, #tpu.memory_space<vmem>>, %arg5: memref<150x1xf32, #tpu.memory_space<vmem>>, %arg6: memref<50x150xbf16, #tpu.memory_space<vmem>>, %arg7: memref<50x1xf32, #tpu.memory_space<vmem>>, %arg8: memref<2x50xbf16, #tpu.memory_space<vmem>>, %arg9: memref<2x1xf32, #tpu.memory_space<vmem>>, %arg10: memref<2x128xf32, #tpu.memory_space<vmem>>) attributes {dimension_semantics = [#tpu.dimension_semantics<parallel>], iteration_bounds = array<i64: 1>, scalar_prefetch = 0 : i64, scratch_operands = 0 : i64, tpu.core_type = #tpu.core_type<tc>, window_params = [{transform_indices = @transform_0, window_bounds = array<i64: 6, 128>}, {transform_indices = @transform_1, window_bounds = array<i64: 3, 128>}, {pipeline_mode = #tpu.pipeline_mode<synchronous>, transform_indices = @transform_2, window_bounds = array<i64: 150, 6>}, {pipeline_mode = #tpu.pipeline_mode<synchronous>, transform_indices = @transform_3, window_bounds = array<i64: 150, 22>}, {pipeline_mode = #tpu.pipeline_mode<synchronous>, transform_indices = @transform_4, window_bounds = array<i64: 150, 1>}, {pipeline_mode = #tpu.pipeline_mode<synchronous>, transform_indices = @transform_5, window_bounds = array<i64: 50, 150>}, {pipeline_mode = #tpu.pipeline_mode<synchronous>, transform_indices = @transform_6, window_bounds = array<i64: 50, 1>}, {pipeline_mode = #tpu.pipeline_mode<synchronous>, transform_indices = @transform_7, window_bounds = array<i64: 2, 50>}, {pipeline_mode = #tpu.pipeline_mode<synchronous>, transform_indices = @transform_8, window_bounds = array<i64: 2, 1>}, {transform_indices = @transform_9, window_bounds = array<i64: 2, 128>}]} {
    %c0 = arith.constant 0 : index
    %c0_0 = arith.constant 0 : index
    %0 = vector.load %arg1[%c0, %c0_0] : memref<6x128xf32, #tpu.memory_space<vmem>>, vector<6x128xf32>
    %c0_1 = arith.constant 0 : index
    %c0_2 = arith.constant 0 : index
    %1 = vector.load %arg2[%c0_1, %c0_2] : memref<3x128xi32, #tpu.memory_space<vmem>>, vector<3x128xi32>
    %2 = tpu.iota {dimensions = array<i32: 0>} : vector<22x128xi32>
    %3 = vector.extract_strided_slice %1 {offsets = [0, 0], sizes = [1, 128], strides = [1, 1]} : vector<3x128xi32> to vector<1x128xi32>
    %4 = vector.broadcast %3 : vector<1x128xi32> to vector<22x128xi32>
    %5 = arith.cmpi eq, %2, %4 : vector<22x128xi32>
    %6 = arith.extui %5 : vector<22x128xi1> to vector<22x128xi32>
    %7 = arith.sitofp %6 : vector<22x128xi32> to vector<22x128xf32>
    %8 = vector.extract_strided_slice %1 {offsets = [1, 0], sizes = [1, 128], strides = [1, 1]} : vector<3x128xi32> to vector<1x128xi32>
    %9 = vector.broadcast %8 : vector<1x128xi32> to vector<22x128xi32>
    %10 = arith.cmpi eq, %2, %9 : vector<22x128xi32>
    %11 = arith.extui %10 : vector<22x128xi1> to vector<22x128xi32>
    %12 = arith.sitofp %11 : vector<22x128xi32> to vector<22x128xf32>
    %13 = arith.addf %7, %12 : vector<22x128xf32>
    %14 = vector.extract_strided_slice %1 {offsets = [2, 0], sizes = [1, 128], strides = [1, 1]} : vector<3x128xi32> to vector<1x128xi32>
    %15 = vector.broadcast %14 : vector<1x128xi32> to vector<22x128xi32>
    %16 = arith.cmpi eq, %2, %15 : vector<22x128xi32>
    %17 = arith.extui %16 : vector<22x128xi1> to vector<22x128xi32>
    %18 = arith.sitofp %17 : vector<22x128xi32> to vector<22x128xf32>
    %19 = arith.addf %13, %18 : vector<22x128xf32>
    %c0_3 = arith.constant 0 : index
    %c0_4 = arith.constant 0 : index
    %20 = vector.load %arg3[%c0_3, %c0_4] : memref<150x6xf32, #tpu.memory_space<vmem>>, vector<150x6xf32>
    %cst = arith.constant dense<0.000000e+00> : vector<150x128xf32>
    %21 = tpu.matmul %20, %0, %cst {dimension_numbers = #tpu.dot_dimension_numbers<[1], [0], [0], [1], [0, 0, 1, 1], [], []>} : vector<150x6xf32>, vector<6x128xf32>, vector<150x128xf32> -> vector<150x128xf32>
    %c0_5 = arith.constant 0 : index
    %c0_6 = arith.constant 0 : index
    %22 = vector.load %arg4[%c0_5, %c0_6] : memref<150x22xf32, #tpu.memory_space<vmem>>, vector<150x22xf32>
    %cst_7 = arith.constant dense<0.000000e+00> : vector<150x128xf32>
    %23 = tpu.matmul %22, %19, %cst_7 {dimension_numbers = #tpu.dot_dimension_numbers<[1], [0], [0], [1], [0, 0, 1, 1], [], []>} : vector<150x22xf32>, vector<22x128xf32>, vector<150x128xf32> -> vector<150x128xf32>
    %24 = arith.addf %21, %23 : vector<150x128xf32>
    %c0_8 = arith.constant 0 : index
    %c0_9 = arith.constant 0 : index
    %25 = vector.load %arg5[%c0_8, %c0_9] : memref<150x1xf32, #tpu.memory_space<vmem>>, vector<150x1xf32>
    %26 = vector.broadcast %25 : vector<150x1xf32> to vector<150x128xf32>
    %27 = arith.addf %24, %26 : vector<150x128xf32>
    %cst_10 = arith.constant 0.000000e+00 : f32
    %28 = vector.broadcast %cst_10 : f32 to vector<150x128xf32>
    %29 = arith.maximumf %27, %28 : vector<150x128xf32>
    %30 = arith.truncf %29 : vector<150x128xf32> to vector<150x128xbf16>
    %c0_11 = arith.constant 0 : index
    %c0_12 = arith.constant 0 : index
    %31 = vector.load %arg6[%c0_11, %c0_12] : memref<50x150xbf16, #tpu.memory_space<vmem>>, vector<50x150xbf16>
    %cst_13 = arith.constant dense<0.000000e+00> : vector<50x128xf32>
    %32 = tpu.matmul %31, %30, %cst_13 {dimension_numbers = #tpu.dot_dimension_numbers<[1], [0], [0], [1], [0, 0, 1, 1], [], []>} : vector<50x150xbf16>, vector<150x128xbf16>, vector<50x128xf32> -> vector<50x128xf32>
    %c0_14 = arith.constant 0 : index
    %c0_15 = arith.constant 0 : index
    %33 = vector.load %arg7[%c0_14, %c0_15] : memref<50x1xf32, #tpu.memory_space<vmem>>, vector<50x1xf32>
    %34 = vector.broadcast %33 : vector<50x1xf32> to vector<50x128xf32>
    %35 = arith.addf %32, %34 : vector<50x128xf32>
    %cst_16 = arith.constant 0.000000e+00 : f32
    %36 = vector.broadcast %cst_16 : f32 to vector<50x128xf32>
    %37 = arith.maximumf %35, %36 : vector<50x128xf32>
    %38 = arith.truncf %37 : vector<50x128xf32> to vector<50x128xbf16>
    %c0_17 = arith.constant 0 : index
    %c0_18 = arith.constant 0 : index
    %39 = vector.load %arg8[%c0_17, %c0_18] : memref<2x50xbf16, #tpu.memory_space<vmem>>, vector<2x50xbf16>
    %cst_19 = arith.constant dense<0.000000e+00> : vector<2x128xf32>
    %40 = tpu.matmul %39, %38, %cst_19 {dimension_numbers = #tpu.dot_dimension_numbers<[1], [0], [0], [1], [0, 0, 1, 1], [], []>} : vector<2x50xbf16>, vector<50x128xbf16>, vector<2x128xf32> -> vector<2x128xf32>
    %c0_20 = arith.constant 0 : index
    %c0_21 = arith.constant 0 : index
    %41 = vector.load %arg9[%c0_20, %c0_21] : memref<2x1xf32, #tpu.memory_space<vmem>>, vector<2x1xf32>
    %42 = vector.broadcast %41 : vector<2x1xf32> to vector<2x128xf32>
    %43 = arith.addf %40, %42 : vector<2x128xf32>
    %cst_22 = arith.constant 0.000000e+00 : f32
    %44 = vector.broadcast %cst_22 : f32 to vector<2x128xf32>
    %45 = arith.subf %44, %43 : vector<2x128xf32>
    %46 = math.exp %45 : vector<2x128xf32>
    %cst_23 = arith.constant 1.000000e+00 : f32
    %47 = vector.broadcast %cst_23 : f32 to vector<2x128xf32>
    %48 = arith.addf %47, %46 : vector<2x128xf32>
    %49 = tpu.reciprocal %48 {approx = true} : vector<2x128xf32> -> vector<2x128xf32>
    %50 = tpu.iota {dimensions = array<i32: 0>} : vector<2x128xi32>
    %c0_i32 = arith.constant 0 : i32
    %51 = vector.broadcast %c0_i32 : i32 to vector<2x128xi32>
    %52 = arith.cmpi eq, %50, %51 : vector<2x128xi32>
    %cst_24 = arith.constant 0.000000e+00 : f32
    %cst_25 = arith.constant 1.000000e+00 : f32
    %53 = vector.broadcast %cst_24 : f32 to vector<2x128xf32>
    %54 = arith.maximumf %53, %43 : vector<2x128xf32>
    %55 = vector.broadcast %cst_25 : f32 to vector<2x128xf32>
    %56 = arith.minimumf %55, %54 : vector<2x128xf32>
    %57 = arith.select %52, %56, %49 : vector<2x128xi1>, vector<2x128xf32>
    %c0_26 = arith.constant 0 : index
    %c0_27 = arith.constant 0 : index
    %58 = vector.load %arg10[%c0_26, %c0_27] : memref<2x128xf32, #tpu.memory_space<vmem>>, vector<2x128xf32>
    tpu.vector_store %arg10[%c0_26, %c0_27], %57 {strides = array<i32>} : memref<2x128xf32, #tpu.memory_space<vmem>>, vector<2x128xf32>,
    return
  }
  func.func @transform_0(%arg0: i32) -> (i32, i32) {
    %c0_i32 = arith.constant 0 : i32
    %c0_i32_0 = arith.constant 0 : i32
    return %c0_i32, %arg0 : i32, i32
  }
  func.func @transform_1(%arg0: i32) -> (i32, i32) {
    %c0_i32 = arith.constant 0 : i32
    %c0_i32_0 = arith.constant 0 : i32
    return %c0_i32, %arg0 : i32, i32
  }
  func.func @transform_2(%arg0: i32) -> (i32, i32) {
    %c0_i32 = arith.constant 0 : i32
    %c0_i32_0 = arith.constant 0 : i32
    %c0_i32_1 = arith.constant 0 : i32
    return %c0_i32, %c0_i32_0 : i32, i32
  }
  func.func @transform_3(%arg0: i32) -> (i32, i32) {
    %c0_i32 = arith.constant 0 : i32
    %c0_i32_0 = arith.constant 0 : i32
    %c0_i32_1 = arith.constant 0 : i32
    return %c0_i32, %c0_i32_0 : i32, i32
  }
  func.func @transform_4(%arg0: i32) -> (i32, i32) {
    %c0_i32 = arith.constant 0 : i32
    %c0_i32_0 = arith.constant 0 : i32
    %c0_i32_1 = arith.constant 0 : i32
    return %c0_i32, %c0_i32_0 : i32, i32
  }
  func.func @transform_5(%arg0: i32) -> (i32, i32) {
    %c0_i32 = arith.constant 0 : i32
    %c0_i32_0 = arith.constant 0 : i32
    %c0_i32_1 = arith.constant 0 : i32
    return %c0_i32, %c0_i32_0 : i32, i32
  }
  func.func @transform_6(%arg0: i32) -> (i32, i32) {
    %c0_i32 = arith.constant 0 : i32
    %c0_i32_0 = arith.constant 0 : i32
    %c0_i32_1 = arith.constant 0 : i32
    return %c0_i32, %c0_i32_0 : i32, i32
  }
  func.func @transform_7(%arg0: i32) -> (i32, i32) {
    %c0_i32 = arith.constant 0 : i32
    %c0_i32_0 = arith.constant 0 : i32
    %c0_i32_1 = arith.constant 0 : i32
    return %c0_i32, %c0_i32_0 : i32, i32
  }
  func.func @transform_8(%arg0: i32) -> (i32, i32) {
    %c0_i32 = arith.constant 0 : i32
    %c0_i32_0 = arith.constant 0 : i32
    %c0_i32_1 = arith.constant 0 : i32
    return %c0_i32, %c0_i32_0 : i32, i32
  }
  func.func @transform_9(%arg0: i32) -> (i32, i32) {
    %c0_i32 = arith.constant 0 : i32
    %c0_i32_0 = arith.constant 0 : i32
    return %c0_i32, %arg0 : i32, i32
  }
}

</mosaic_0001>

<bundles_post_ra>
// kernel: tpu_custom_call.1
= control target key start
LH: loop header
LB: loop body
LE: loop exit
PB: predicated region body
PF: predicated region fallthrough
CT: control target
= control target key end

     0   :  { %vm172_vm0 = vcmask 1045504   ;;  %v36_v3 = vlaneseq  ;;  %v893_v4 = vmov 0   ;;  %vm250_vm1 = vcmask 48128   ;;  %s1296_s0 = inlined_call_operand.vmem [shape: f32[6,128], index: 0, kind: input, shape index: {}]   ;;  %s1297_s1 = inlined_call_operand.vmem [shape: s32[3,128], index: 1, kind: input, shape index: {}]   ;;  %s1298_s2 = inlined_call_operand.vmem [shape: f32[150,6], index: 2, kind: input, shape index: {}]   ;;  %s1299_s3 = inlined_call_operand.vmem [shape: f32[150,22], index: 3, kind: input, shape index: {}]   ;;  %s1300_s4 = inlined_call_operand.vmem [shape: f32[150,1], index: 4, kind: input, shape index: {}]   ;;  %s1301_s5 = inlined_call_operand.vmem [shape: bf16[50,150], index: 5, kind: input, shape index: {}]   ;;  %s1302_s6 = inlined_call_operand.vmem [shape: f32[50,1], index: 6, kind: input, shape index: {}]   ;;  %s1303_s7 = inlined_call_operand.vmem [shape: bf16[2,50], index: 7, kind: input, shape index: {}]   ;;  %s1304_s8 = inlined_call_operand.vmem [shape: f32[2,1], index: 8, kind: input, shape index: {}]   ;;  %s1305_s9 = inlined_call_operand.hbm [shape: f32[2,128], index: 9, kind: output, shape index: {}]  }
   0x1   :  { %v949_v0 = vld [vmem:[%s1296_s0] sm:$0x3f]  ;;  %v399_v1 = vld [vmem:[%s1300_s4 + $0x70] sm:$0xff]  ;;  %861 = vset.pattern.permute.xlu1 %v893_v4  ;;  %860 = vset.pattern.permute.xlu0 %v893_v4  ;;  %v400_v13 = vld [vmem:[%s1300_s4 + $0x78] sm:$0xff]  ;;  %v894_v14 = vmov 0.0  }
   0x2   :  { %v397_v2 = vld [vmem:[%s1300_s4 + $0x60] sm:$0xff]  ;;  %795 = vmatpush.msk.msra.mxu1 %vm172_vm0, %v949_v0  ;;  %476 = vperm.xlu0 %860, %v399_v1   ;;  %v965_v7 = vshrl.u32 %v36_v3, 7 }
   0x3   :  { %v76_v5 = vld [vmem:[%s1298_s2] sm:$0xff]  ;;  %466 = vperm.xlu1 %861, %v397_v2   ;;  %862 = vset.pattern.permute.xlu2 %v893_v4 }
   0x4   :  { %v35_v6 = vld [vmem:[%s1297_s1] sm:$0x7]  ;;  %796 = vmatmul.msk.f32.vlgmr.msra.gmra.mxu1 %vm250_vm1, %v76_v5  ;;  %v39_v11 = vadd.s32 16, %v965_v7  ;;  %v38_v12 = vadd.s32 8, %v965_v7 }
   0x5   :  { %v40_v8 = vperm.slane %v35_v6, 0  ;;  %v50_v9 = vperm.slane %v35_v6, 1  ;;  %v63_v10 = vperm.slane %v35_v6, 2 }
   0x7   :  { %vm41_vm2 = vcmp.eq.s32.totalorder %v965_v7, %v40_v8  ;;  %vm51_vm3 = vcmp.eq.s32.totalorder %v965_v7, %v50_v9  ;;  %vm64_vm4 = vcmp.eq.s32.totalorder %v965_v7, %v63_v10  ;;  %vm43_vm5 = vcmp.eq.s32.totalorder %v39_v11, %v40_v8 }
   0x8   :  { %vm53_vm6 = vcmp.eq.s32.totalorder %v39_v11, %v50_v9  ;;  %vm66_vm7 = vcmp.eq.s32.totalorder %v39_v11, %v63_v10  ;;  %vm42_vm8 = vcmp.eq.s32.totalorder %v38_v12, %v40_v8  ;;  %v768_v15 = vsel %vm43_vm5, 1.0, %v894_v14 }
   0x9   :  { %v771_v16 = vsel %vm53_vm6, 1.0, %v894_v14  ;;  %v774_v17 = vsel %vm66_vm7, 1.0, %v894_v14  ;;  %v767_v18 = vsel %vm42_vm8, 1.0, %v894_v14 }
   0xa   :  { %14 = vsyncpa [#allocation3], 0  ;;  %v398_v19 = vld [vmem:[%s1300_s4 + $0x68] sm:$0xff]  ;;  %v62_v21 = vadd.f32 %v771_v16, %v768_v15  ;;  %vm52_vm9 = vcmp.eq.s32.totalorder %v38_v12, %v50_v9  ;;  %vm65_vm10 = vcmp.eq.s32.totalorder %v38_v12, %v63_v10  ;;  %v766_v22 = vsel %vm41_vm2, 1.0, %v894_v14  ;;  %481 = vperm.xlu0 %860, %v400_v13   ;;  %v95_v32 = vld [vmem:[%s1299_s3] sm:$0xff]  ;;  %s895_s23 = smov [#allocation2]  }
   0xb   :  { %v77_v20 = vld [vmem:[%s1298_s2 + $0x8] sm:$0xff]  ;;  %v770_v23 = vsel %vm52_vm9, 1.0, %v894_v14  ;;  %v773_v24 = vsel %vm65_vm10, 1.0, %v894_v14  ;;  %v769_v25 = vsel %vm51_vm3, 1.0, %v894_v14  ;;  %v772_v26 = vsel %vm64_vm4, 1.0, %v894_v14  ;;  %471 = vperm.xlu1 %861, %v398_v19   ;;  %v393_v33 = vld [vmem:[%s1300_s4 + $0x40] sm:$0xff] }
   0xc   :  { %v75_v27 = vadd.f32 %v774_v17, %v62_v21  ;;  %v61_v28 = vadd.f32 %v770_v23, %v767_v18  ;;  %v60_v29 = vadd.f32 %v769_v25, %v766_v22  ;;  %797 = vmatmul.msk.f32.gmra.mxu1 %vm250_vm1, %v77_v20  ;;  %vm114_vm11 = vcmask 179200   ;;  %v394_v34 = vld [vmem:[%s1300_s4 + $0x48] sm:$0xff]  ;;  %v78_v35 = vld [vmem:[%s1298_s2 + $0x10] sm:$0xff]  ;;  %v392_v38 = vld [vmem:[%s1300_s4 + $0x38] sm:$0xff]  ;;  %s757_s24 = sshll.u32 %s1305_s9, 4  ;;  %s758_s24 = int_to_ptr.hbm [resolvable:$true] %s757_s24 }
   0xd   :  { %v109_v36 = vld [vmem:[%s1299_s3 + $0x70] sm:$0xff]  ;;  %v96_v37 = vld [vmem:[%s1299_s3 + $0x8] sm:$0xff]  ;;  %v389_v39 = vld [vmem:[%s1300_s4 + $0x20] sm:$0xff]  ;;  %vm641_vm12 = vcmask 1042432   ;;  %vm723_vm13 = vcmask 1040384   ;;  %vm719_vm14 = vcmask 408576  }
   0xe   :  { %775 = vmatpush.msk.msra.mxu0 %vm172_vm0, %v75_v27  ;;  %v74_v30 = vadd.f32 %v773_v24, %v61_v28  ;;  %v73_v31 = vadd.f32 %v772_v26, %v60_v29  ;;  %850 = vmatpush.msk.msra.mxu2 %vm172_vm0, %v75_v27  ;;  %v79_v40 = vld [vmem:[%s1298_s2 + $0x18] sm:$0xff]  ;;  %v97_v43 = vld [vmem:[%s1299_s3 + $0x10] sm:$0xff]  ;;  %v80_v46 = vld [vmem:[%s1298_s2 + $0x20] sm:$0xff]  ;;  %vm745_vm15 = vcmp.eq.s32.totalorder %v965_v7, 0 }
   0xf   :  { %851 = vmatpush.msk.msra.mxu3 %vm172_vm0, %v75_v27  ;;  %v110_v41 = vld [vmem:[%s1299_s3 + $0x78] sm:$0xff]  ;;  %v387_v44 = vld [vmem:[%s1300_s4 + $0x10] sm:$0xff]  ;;  %v111_v48 = vld [vmem:[%s1299_s3 + $0x80] sm:$0xff] }
  0x10   :  { %190 = vmatpush.msra.mxu0 %v74_v30  ;;  %852 = vmatpush.msra.mxu2 %v74_v30  ;;  %v91_v42 = vld [vmem:[%s1298_s2 + $0x78] sm:$0xff]  ;;  %v395_v47 = vld [vmem:[%s1300_s4 + $0x50] sm:$0xff]  ;;  %v92_v49 = vld [vmem:[%s1298_s2 + $0x80] sm:$0xff] }
  0x11   :  { %853 = vmatpush.msra.mxu3 %v74_v30  ;;  %v388_v45 = vld [vmem:[%s1300_s4 + $0x18] sm:$0xff]  ;;  %456 = vperm.xlu2 %862, %v395_v47   ;;  %v385_v51 = vld [vmem:[%s1300_s4] sm:$0xff]  ;;  %v386_v52 = vld [vmem:[%s1300_s4 + $0x8] sm:$0xff] }
  0x12   :  { %191 = vmatpush.msra.mxu0 %v73_v31  ;;  %854 = vmatpush.msra.mxu2 %v73_v31  ;;  %v98_v50 = vld [vmem:[%s1299_s3 + $0x18] sm:$0xff]  ;;  %v81_v53 = vld [vmem:[%s1298_s2 + $0x28] sm:$0xff]  ;;  %v99_v57 = vld [vmem:[%s1299_s3 + $0x20] sm:$0xff] }
  0x13   :  { %776 = vmatmul.msk.f32.vlgmr.msra.gmra.mxu0 %vm114_vm11, %v95_v32  ;;  %855 = vmatpush.msra.mxu3 %v73_v31  ;;  %v396_v54 = vld [vmem:[%s1300_s4 + $0x58] sm:$0xff]  ;;  %v112_v55 = vld [vmem:[%s1299_s3 + $0x88] sm:$0xff]  ;;  %v82_v58 = vld [vmem:[%s1298_s2 + $0x30] sm:$0xff] }
  0x14   :  { %446 = vperm.xlu0 %860, %v393_v33   ;;  %856 = vmatpush.msk.msrb.mxu2 %vm172_vm0, %v949_v0  ;;  %v93_v56 = vld [vmem:[%s1298_s2 + $0x88] sm:$0xff]  ;;  %v391_v59 = vld [vmem:[%s1300_s4 + $0x30] sm:$0xff]  ;;  %v83_v63 = vld [vmem:[%s1298_s2 + $0x38] sm:$0xff] }
  0x15   :  { %451 = vperm.xlu1 %861, %v394_v34   ;;  %798 = vmatmul.msk.f32.gmra.mxu1 %vm250_vm1, %v78_v35  ;;  %v113_v60 = vld [vmem:[%s1299_s3 + $0x90] sm:$0x3f]  ;;  %v100_v62 = vld [vmem:[%s1299_s3 + $0x28] sm:$0xff]  ;;  %v84_v3 = vld [vmem:[%s1298_s2 + $0x40] sm:$0xff] }
  0x16   :  { %790 = vmatmul.msk.f32.vlgmr.msra.gmra.mxu2 %vm114_vm11, %v109_v36  ;;  %791 = vmatmul.msk.f32.vlgmr.msra.gmra.mxu3 %vm114_vm11, %v110_v41  ;;  %v94_v61 = vld [vmem:[%s1298_s2 + $0x90] sm:$0x3f]  ;;  %v390_v0 = vld [vmem:[%s1300_s4 + $0x28] sm:$0xff]  ;;  %v102_v6 = vld [vmem:[%s1299_s3 + $0x38] sm:$0xff] }
  0x17   :  { %v402_v1 = vld [vmem:[%s1300_s4 + $0x88] sm:$0xff]  ;;  %v101_v2 = vld [vmem:[%s1299_s3 + $0x30] sm:$0xff]  ;;  %v554_v11 = vld [vmem:[%s1302_s6] sm:$0xff] }
  0x18   :  { %v560_v4 = vld [vmem:[%s1302_s6 + $0x30] sm:$0x3]  ;;  %v559_v5 = vld [vmem:[%s1302_s6 + $0x28] sm:$0xff]  ;;  %v103_v12 = vld [vmem:[%s1299_s3 + $0x40] sm:$0xff] }
  0x19   :  { %461 = vperm.xlu2 %862, %v396_v54   ;;  %v85_v8 = vld [vmem:[%s1298_s2 + $0x48] sm:$0xff]  ;;  %v556_v9 = vld [vmem:[%s1302_s6 + $0x10] sm:$0xff]  ;;  %v401_v15 = vld [vmem:[%s1300_s4 + $0x80] sm:$0xff] }
  0x1a   :  { %v403_v10 = vld [vmem:[%s1300_s4 + $0x90] sm:$0x3f]  ;;  %v555_v14 = vld [vmem:[%s1302_s6 + $0x8] sm:$0xff]  ;;  %v87_v17 = vld [vmem:[%s1298_s2 + $0x58] sm:$0xff] }
  0x1b   :  { %777 = vmatmul.msk.f32.gmra.mxu0 %vm114_vm11, %v96_v37  ;;  %v86_v13 = vld [vmem:[%s1298_s2 + $0x50] sm:$0xff]  ;;  %v104_v16 = vld [vmem:[%s1299_s3 + $0x48] sm:$0xff]  ;;  %v88_v19 = vld [vmem:[%s1298_s2 + $0x60] sm:$0xff] }
  0x1c   :  { %441 = vperm.xlu0 %860, %v392_v38   ;;  %v105_v18 = vld [vmem:[%s1299_s3 + $0x50] sm:$0xff]  ;;  %v558_v20 = vld [vmem:[%s1302_s6 + $0x20] sm:$0xff]  ;;  %v106_v21 = vld [vmem:[%s1299_s3 + $0x58] sm:$0xff] }
  0x1d   :  { %426 = vperm.xlu1 %861, %v389_v39   ;;  %799 = vmatmul.msk.f32.gmra.mxu1 %vm250_vm1, %v79_v40  ;;  %v89_v22 = vld [vmem:[%s1298_s2 + $0x68] sm:$0xff]  ;;  %v557_v23 = vld [vmem:[%s1302_s6 + $0x18] sm:$0xff]  ;;  %v107_v24 = vld [vmem:[%s1299_s3 + $0x60] sm:$0xff] }
  0x1e   :  { %811 = vmatmul.msk.f32.vlgmr.msrb.gmra.mxu2 %vm250_vm1, %v91_v42  ;;  %792 = vmatmul.msk.f32.gmra.mxu3 %vm114_vm11, %v111_v48  ;;  %v90_v25 = vld [vmem:[%s1298_s2 + $0x70] sm:$0xff]  ;;  %v713_v26 = vld [vmem:[%s1304_s8] sm:$0x3]  ;;  %v108_v29 = vld [vmem:[%s1299_s3 + $0x68] sm:$0xff]  ;;  %s755_s2 = sshll.u32 %s895_s23, 4  ;;  %s756_s2 = int_to_ptr.vmem [resolvable:$true] %s755_s2 }
  0x21   :  { %436 = vperm.xlu2 %862, %v391_v59  }
  0x23   :  { %778 = vmatmul.msk.f32.gmra.mxu0 %vm114_vm11, %v97_v43 }
  0x24   :  { %416 = vperm.xlu0 %860, %v387_v44  }
  0x25   :  { %421 = vperm.xlu1 %861, %v388_v45   ;;  %800 = vmatmul.msk.f32.gmra.mxu1 %vm250_vm1, %v80_v46 }
  0x26   :  { %812 = vmatmul.msk.f32.gmra.mxu2 %vm250_vm1, %v92_v49  ;;  %793 = vmatmul.msk.f32.gmra.mxu3 %vm114_vm11, %v112_v55 }
  0x29   :  { %431 = vperm.xlu2 %862, %v390_v0  }
  0x2b   :  { %779 = vmatmul.msk.f32.gmra.mxu0 %vm114_vm11, %v98_v50 }
  0x2c   :  { %406 = vperm.xlu0 %860, %v385_v51  }
  0x2d   :  { %411 = vperm.xlu1 %861, %v386_v52   ;;  %801 = vmatmul.msk.f32.gmra.mxu1 %vm250_vm1, %v81_v53 }
  0x2e   :  { %813 = vmatmul.msk.f32.gmra.mxu2 %vm250_vm1, %v93_v56  ;;  %794 = vmatmul.msk.f32.gmra.mxu3 %vm114_vm11, %v113_v60 }
  0x31   :  { %496 = vperm.xlu2 %862, %v403_v10  }
  0x33   :  { %780 = vmatmul.msk.f32.gmra.mxu0 %vm114_vm11, %v99_v57 }
  0x34   :  { %491 = vperm.xlu0 %860, %v402_v1  }
  0x35   :  { %802 = vmatmul.msk.f32.gmra.mxu1 %vm250_vm1, %v82_v58  ;;  %593 = vperm.xlu1 %861, %v560_v4  }
  0x36   :  { %814 = vmatmul.msk.f32.gmra.mxu2 %vm250_vm1, %v94_v61 }
  0x39   :  { %486 = vperm.xlu2 %862, %v401_v15  }
  0x3b   :  { %781 = vmatmul.msk.f32.gmra.mxu0 %vm114_vm11, %v100_v62 }
  0x3c   :  { %588 = vperm.xlu0 %860, %v559_v5  }
  0x3d   :  { %803 = vmatmul.msk.f32.gmra.mxu1 %vm250_vm1, %v83_v63  ;;  %573 = vperm.xlu1 %861, %v556_v9  }
  0x41   :  { %583 = vperm.xlu2 %862, %v558_v20  }
  0x43   :  { %782 = vmatmul.msk.f32.gmra.mxu0 %vm114_vm11, %v101_v2 }
  0x44   :  { %563 = vperm.xlu0 %860, %v554_v11  }
  0x45   :  { %804 = vmatmul.msk.f32.gmra.mxu1 %vm250_vm1, %v84_v3  ;;  %568 = vperm.xlu1 %861, %v555_v14  }
  0x49   :  { %578 = vperm.xlu2 %862, %v557_v23  }
  0x4b   :  { %783 = vmatmul.msk.f32.gmra.mxu0 %vm114_vm11, %v102_v6 }
  0x4d   :  { %805 = vmatmul.msk.f32.gmra.mxu1 %vm250_vm1, %v85_v8 }
  0x51   :  { %716 = vperm.xlu2 %862, %v713_v26  }
  0x53   :  { %784 = vmatmul.msk.f32.gmra.mxu0 %vm114_vm11, %v103_v12 }
  0x55   :  { %806 = vmatmul.msk.f32.gmra.mxu1 %vm250_vm1, %v86_v13 }
  0x5b   :  { %785 = vmatmul.msk.f32.gmra.mxu0 %vm114_vm11, %v104_v16 }
  0x5d   :  { %807 = vmatmul.msk.f32.gmra.mxu1 %vm250_vm1, %v87_v17 }
  0x63   :  { %786 = vmatmul.msk.f32.gmra.mxu0 %vm114_vm11, %v105_v18 }
  0x65   :  { %808 = vmatmul.msk.f32.gmra.mxu1 %vm250_vm1, %v88_v19 }
  0x6b   :  { %787 = vmatmul.msk.f32.gmra.mxu0 %vm114_vm11, %v106_v21  ;;  %v1219_v40 = vpop.permute.xlu2 %456 }
  0x6d   :  { %809 = vmatmul.msk.f32.gmra.mxu1 %vm250_vm1, %v89_v22 }
  0x73   :  { %788 = vmatmul.msk.f32.gmra.mxu0 %vm114_vm11, %v107_v24  ;;  %v1221_v47 = vpop.permute.xlu2 %461 }
  0x74   :  { %v1203_v27 = vpop.permute.xlu0 %476 }
  0x75   :  { %810 = vmatmul.msk.f32.gmra.mxu1 %vm250_vm1, %v90_v25  ;;  %v1205_v28 = vpop.permute.xlu1 %466 }
  0x7b   :  { %789 = vmatmul.msk.f32.gmra.mxu0 %vm114_vm11, %v108_v29  ;;  %v437_v60 = vpop.permute.xlu2 %436 }
  0x7c   :  { %v482_v30 = vpop.permute.xlu0 %481 }
  0x7d   :  { %v1211_v31 = vpop.permute.xlu1 %471 }
  0x81   :  { %v328_v32 = vpop.f32.mrf.mxu1 }
  0x83   :  { %v432_v10 = vpop.permute.xlu2 %431 }
  0x86   :  { %v1213_v33 = vpop.permute.xlu0 %446 }
  0x87   :  { %v1215_v34 = vpop.permute.xlu1 %451 }
  0x89   :  { %v331_v35 = vpop.f32.mrf.mxu1 }
  0x8b   :  { %v497_v17 = vpop.permute.xlu2 %496 }
  0x8e   :  { %v1217_v36 = vpop.permute.xlu0 %441 }
  0x8f   :  { %v427_v37 = vpop.permute.xlu1 %426 }
  0x90   :  { %v193_v38 = vpop.f32.mrf.mxu0 }
  0x91   :  { %v329_v39 = vadd.f32 %v328_v32, %v193_v38 }
  0x92   :  { %v334_v41 = vpop.f32.mrf.mxu1 }
  0x96   :  { %v417_v42 = vpop.permute.xlu0 %416 }
  0x97   :  { %v422_v43 = vpop.permute.xlu1 %421 }
  0x98   :  { %v196_v44 = vpop.f32.mrf.mxu0 }
  0x99   :  { %v332_v45 = vadd.f32 %v331_v35, %v196_v44  ;;  %v1223_v49 = vpop.f32.mrf.mxu2  ;;  %v238_v61 = vpop.f32.mrf.mxu3 }
  0x9a   :  { %v337_v46 = vpop.f32.mrf.mxu1 }
  0x9e   :  { %v407_v48 = vpop.permute.xlu0 %406 }
  0x9f   :  { %v412_v50 = vpop.permute.xlu1 %411  ;;  %v499_v51 = vadd.f32 %v407_v48, %v329_v39 }
  0xa0   :  { %v500_v52 = vadd.f32 %v412_v50, %v332_v45  ;;  %v199_v53 = vpop.f32.mrf.mxu0 }
  0xa1   :  { %v518_v54 = vmax.f32 %v499_v51, 0.0  ;;  %v335_v55 = vadd.f32 %v334_v41, %v199_v53  ;;  %v373_v62 = vpop.f32.mrf.mxu2  ;;  %v241_v8 = vpop.f32.mrf.mxu3 }
  0xa2   :  { %v519_v56 = vmax.f32 %v500_v52, 0.0  ;;  %v340_v57 = vpop.f32.mrf.mxu1  ;;  %v374_v63 = vadd.f32 %v373_v62, %v238_v61  ;;  %v487_v41 = vpop.permute.xlu2 %486 }
  0xa3   :  { %v501_v58 = vadd.f32 %v417_v42, %v335_v55 }
  0xa4   :  { %v1225_v59 = vpack.c.bf16 %v519_v56, %v518_v54  ;;  %v1227_v2 = vadd.f32 %v482_v30, %v374_v63 }
  0xa5   :  { %v520_v5 = vmax.f32 %v501_v58, 0.0 }
  0xa6   :  { %v492_v42 = vpop.permute.xlu0 %491 }
  0xa8   :  { %v202_v0 = vpop.f32.mrf.mxu0 }
  0xa9   :  { %v338_v1 = vadd.f32 %v337_v46, %v202_v0  ;;  %v376_v9 = vpop.f32.mrf.mxu2  ;;  %v244_v15 = vpop.f32.mrf.mxu3 }
  0xaa   :  { %v343_v3 = vpop.f32.mrf.mxu1  ;;  %v377_v25 = vadd.f32 %v376_v9, %v241_v8 }
  0xab   :  { %v502_v4 = vadd.f32 %v422_v43, %v338_v1 }
  0xac   :  { %v515_v45 = vadd.f32 %v487_v41, %v377_v25 }
  0xad   :  { %v521_v6 = vmax.f32 %v502_v4, 0.0 }
  0xae   :  { %v534_v51 = vmax.f32 %v515_v45, 0.0  ;;  %v848_v45 = vld [vmem:[%s1301_s5 + $0x24] sm:$0xf] }
  0xaf   :  { %v1229_v11 = vpack.c.bf16 %v521_v6, %v520_v5 }
  0xb0   :  { %v205_v12 = vpop.f32.mrf.mxu0 }
  0xb1   :  { %v341_v13 = vadd.f32 %v340_v57, %v205_v12  ;;  %v379_v16 = vpop.f32.mrf.mxu2  ;;  %v247_v29 = vpop.f32.mrf.mxu3 }
  0xb2   :  { %v346_v14 = vpop.f32.mrf.mxu1  ;;  %v380_v26 = vadd.f32 %v379_v16, %v244_v15 }
  0xb3   :  { %v503_v19 = vadd.f32 %v427_v37, %v341_v13  ;;  %v819_v13 = vld [vmem:[%s1301_s5 + $0x8] sm:$0xf0] }
  0xb4   :  { %v516_v37 = vadd.f32 %v492_v42, %v380_v26 }
  0xb5   :  { %v522_v23 = vmax.f32 %v503_v19, 0.0 }
  0xb6   :  { %v535_v52 = vmax.f32 %v516_v37, 0.0 }
  0xb8   :  { %v208_v18 = vpop.f32.mrf.mxu0  ;;  %v545_v57 = vpack.c.bf16 %v535_v52, %v534_v51  ;;  %v825_v52 = vld [vmem:[%s1301_s5 + $0x10] sm:$0xf] }
  0xb9   :  { %v344_v20 = vadd.f32 %v343_v3, %v208_v18  ;;  %v382_v30 = vpop.f32.mrf.mxu2 }
  0xba   :  { %v349_v21 = vpop.f32.mrf.mxu1  ;;  %v383_v35 = vadd.f32 %v382_v30, %v247_v29 }
  0xbb   :  { %v504_v22 = vadd.f32 %v432_v10, %v344_v20 }
  0xbc   :  { %v517_v43 = vadd.f32 %v497_v17, %v383_v35  ;;  %v533_v17 = vmax.f32 %v1227_v2, 0.0 }
  0xbd   :  { %v523_v24 = vmax.f32 %v504_v22, 0.0 }
  0xbe   :  { %v536_v48 = vmax.f32 %v517_v43, 0.0 }
  0xbf   :  { %v1231_v32 = vpack.c.bf16 %v523_v24, %v522_v23 }
  0xc0   :  { %v211_v38 = vpop.f32.mrf.mxu0  ;;  %v546_v50 = vpack.c.bf16 %v536_v48, %v536_v48  ;;  %v845_v48 = vld [vmem:[%s1301_s5 + $0x4] sm:$0xf0] }
  0xc1   :  { %v347_v39 = vadd.f32 %v346_v14, %v211_v38 }
  0xc2   :  { %v352_v44 = vpop.f32.mrf.mxu1  ;;  %v643_v53 = vsel %vm641_vm12, %v546_v50, 0 }
  0xc3   :  { %v505_v46 = vadd.f32 %v437_v60, %v347_v39  ;;  %679 = vmatpush.bf16.msrb.mxu3 %v643_v53  ;;  %v847_v53 = vld [vmem:[%s1301_s5 + $0x14] sm:$0xf0] }
  0xc5   :  { %v524_v61 = vmax.f32 %v505_v46, 0.0  ;;  %v817_v46 = vld [vmem:[%s1301_s5] sm:$0xf] }
  0xc6   :  { %v818_v50 = vor.u32 %v845_v48, %v817_v46  ;;  %v712_v46 = vld [vmem:[%s1303_s7] sm:$0x1] }
  0xc7   :  { %680 = vmatpush.bf16.msrb.mxu3 %v545_v57 }
  0xc8   :  { %v214_v54 = vpop.f32.mrf.mxu0 }
  0xc9   :  { %v350_v55 = vadd.f32 %v349_v21, %v214_v54  ;;  %v826_v54 = vor.u32 %v847_v53, %v825_v52 }
  0xca   :  { %v355_v56 = vpop.f32.mrf.mxu1 }
  0xcb   :  { %v506_v58 = vadd.f32 %v1217_v36, %v350_v55  ;;  %v844_v36 = vld [vmem:[%s1301_s5 + $0x4] sm:$0xf]  ;;  %v849_v55 = vld [vmem:[%s1301_s5 + $0x24] sm:$0xf0] }
  0xcc   :  { %v822_v16 = vor.u32 %v844_v36, %v819_v13 }
  0xcd   :  { %v525_v62 = vmax.f32 %v506_v58, 0.0 }
  0xce   :  { %839 = vmatmul.msk.bf16.vlgmr.msrb.gmra.mxu3 %vm114_vm11, %v822_v16 }
  0xcf   :  { %v540_v63 = vpack.c.bf16 %v525_v62, %v524_v61 }
  0xd0   :  { %v217_v0 = vpop.f32.mrf.mxu0 }
  0xd2   :  { %v358_v1 = vpop.f32.mrf.mxu1 }
  0xd8   :  { %v220_v60 = vpop.f32.mrf.mxu0 }
  0xd9   :  { %v356_v24 = vadd.f32 %v355_v56, %v220_v60  ;;  %v589_v60 = vpop.permute.xlu0 %588 }
  0xda   :  { %v361_v3 = vpop.f32.mrf.mxu1 }
  0xdb   :  { %v508_v35 = vadd.f32 %v1215_v34, %v356_v24 }
  0xdd   :  { %v527_v42 = vmax.f32 %v508_v35, 0.0 }
  0xe0   :  { %v223_v4 = vpop.f32.mrf.mxu0 }
  0xe2   :  { %v364_v5 = vpop.f32.mrf.mxu1 }
  0xe8   :  { %v226_v6 = vpop.f32.mrf.mxu0 }
  0xe9   :  { %v362_v18 = vadd.f32 %v361_v3, %v226_v6 }
  0xea   :  { %v367_v8 = vpop.f32.mrf.mxu1 }
  0xeb   :  { %v510_v25 = vadd.f32 %v1221_v47, %v362_v18  ;;  %v827_v47 = vld [vmem:[%s1301_s5 + $0x18] sm:$0xf0]  ;;  %v584_v18 = vpop.permute.xlu2 %583 }
  0xed   :  { %v529_v38 = vmax.f32 %v510_v25, 0.0 }
  0xf0   :  { %v229_v9 = vpop.f32.mrf.mxu0 }
  0xf1   :  { %v365_v14 = vadd.f32 %v364_v5, %v229_v9 }
  0xf2   :  { %v370_v10 = vpop.f32.mrf.mxu1 }
  0xf3   :  { %v371_v12 = vadd.f32 %v370_v10, %v1223_v49  ;;  %v359_v49 = vadd.f32 %v358_v1, %v223_v4  ;;  %v511_v21 = vadd.f32 %v1205_v28, %v365_v14  ;;  %v846_v28 = vld [vmem:[%s1301_s5 + $0x14] sm:$0xf]  ;;  %v594_v1 = vpop.permute.xlu1 %593 }
  0xf4   :  { %v830_v43 = vor.u32 %v846_v28, %v827_v47 }
  0xf5   :  { %v513_v15 = vadd.f32 %v1203_v27, %v371_v12  ;;  %v353_v27 = vadd.f32 %v352_v44, %v217_v0  ;;  %v509_v29 = vadd.f32 %v1219_v40, %v359_v49  ;;  %v530_v2 = vmax.f32 %v511_v21, 0.0 }
  0xf6   :  { %840 = vmatmul.msk.bf16.gmra.mxu3 %vm114_vm11, %v830_v43 }
  0xf7   :  { %v532_v19 = vmax.f32 %v513_v15, 0.0  ;;  %v528_v41 = vmax.f32 %v509_v29, 0.0 }
  0xf8   :  { %v232_v20 = vpop.f32.mrf.mxu0 }
  0xf9   :  { %v544_v22 = vpack.c.bf16 %v533_v17, %v532_v19  ;;  %v368_v23 = vadd.f32 %v367_v8, %v232_v20  ;;  %v542_v40 = vpack.c.bf16 %v529_v38, %v528_v41  ;;  %v564_v8 = vpop.permute.xlu0 %563 }
  0xfb   :  { %v512_v26 = vadd.f32 %v1211_v31, %v368_v23  ;;  %645 = vmatpush.bf16.msra.mxu2 %v544_v22  ;;  %v507_v31 = vadd.f32 %v1213_v33, %v353_v27  ;;  %v835_v33 = vld [vmem:[%s1301_s5 + $0x28] sm:$0xf0]  ;;  %v574_v4 = vpop.permute.xlu1 %573  ;;  %v579_v22 = vpop.permute.xlu2 %578 }
  0xfc   :  { %v838_v37 = vor.u32 %v848_v45, %v835_v33 }
  0xfd   :  { %v531_v30 = vmax.f32 %v512_v26, 0.0  ;;  %v526_v44 = vmax.f32 %v507_v31, 0.0 }
  0xff   :  { %v543_v39 = vpack.c.bf16 %v531_v30, %v530_v2  ;;  %v541_v34 = vpack.c.bf16 %v527_v42, %v526_v44 }
 0x101   :  { %646 = vmatpush.bf16.msra.mxu2 %v543_v39 }
 0x103   :  { %v569_v10 = vpop.permute.xlu1 %568  ;;  %v717_v48 = vpop.permute.xlu2 %716 }
 0x105   :  { %647 = vmatpush.bf16.msra.mxu2 %v542_v40 }
 0x106   :  { %841 = vmatmul.msk.bf16.gmra.mxu3 %vm114_vm11, %v838_v37 }
 0x109   :  { %648 = vmatpush.bf16.msra.mxu2 %v541_v34 }
 0x10d   :  { %649 = vmatpush.bf16.msra.mxu2 %v540_v63 }
 0x111   :  { %650 = vmatpush.bf16.msra.mxu2 %v1231_v32  ;;  %v553_v32 = vld [vmem:[%s1301_s5 + $0x30] sm:$0x11] }
 0x112   :  { %v616_v51 = vunpack.c.h.b16 %v553_v32  ;;  %v615_v57 = vunpack.c.l.b16 %v553_v32 }
 0x114   :  { %v623_v58 = vpack.c.b16 %v615_v57, %v615_v57 }
 0x115   :  { %651 = vmatpush.bf16.msra.mxu2 %v1229_v11  ;;  %v624_v11 = vpack.c.b16 %v616_v51, %v616_v51 }
 0x117   :  { %842 = vmatmul.msk.bf16.gmra.mxu3 %vm114_vm11, %v624_v11 }
 0x119   :  { %652 = vmatpush.bf16.msra.mxu2 %v1225_v59  ;;  %v833_v59 = vld [vmem:[%s1301_s5 + $0x20] sm:$0xf] }
 0x11a   :  { %v834_v56 = vor.u32 %v849_v55, %v833_v59 }
 0x11c   :  { %653 = vmatmul.bf16.vlgmr.msra.gmra.mxu2 %v818_v50 }
 0x12c   :  { %658 = vmatmul.bf16.gmra.mxu2 %v826_v54 }
 0x13c   :  { %663 = vmatmul.bf16.gmra.mxu2 %v834_v56 }
 0x14c   :  { %668 = vmatmul.bf16.gmra.mxu2 %v623_v58 }
 0x151   :  { %v682_v61 = vpop.f32.mrf.mxu3 }
 0x159   :  { %v684_v62 = vpop.f32.mrf.mxu3 }
 0x179   :  { %v687_v63 = vpop.f32.mrf.mxu3 }
 0x181   :  { %v689_v0 = vpop.f32.mrf.mxu3 }
 0x189   :  { %v692_v3 = vpop.f32.mrf.mxu3 }
 0x191   :  { %v694_v6 = vpop.f32.mrf.mxu3 }
 0x19a   :  { %v697_v15 = vpop.f32.mrf.mxu3 }
 0x19f   :  { %v654_v5 = vpop.f32.mrf.mxu2 }
 0x1a0   :  { %v655_v9 = vadd.f32 %v654_v5, %v564_v8 }
 0x1a2   :  { %v683_v36 = vadd.f32 %v682_v61, %v655_v9  ;;  %v699_v49 = vpop.f32.mrf.mxu3 }
 0x1a4   :  { %v701_v16 = vmax.f32 %v683_v36, 0.0 }
 0x1a7   :  { %v656_v12 = vpop.f32.mrf.mxu2 }
 0x1a8   :  { %v657_v13 = vadd.f32 %v656_v12, %v569_v10 }
 0x1aa   :  { %v685_v14 = vadd.f32 %v684_v62, %v657_v13 }
 0x1ac   :  { %v702_v17 = vmax.f32 %v685_v14, 0.0 }
 0x1ae   :  { %v708_v19 = vpack.c.bf16 %v702_v17, %v701_v16 }
 0x1af   :  { %v659_v20 = vpop.f32.mrf.mxu2 }
 0x1b0   :  { %v660_v21 = vadd.f32 %v659_v20, %v574_v4 }
 0x1b2   :  { %v688_v24 = vadd.f32 %v687_v63, %v660_v21 }
 0x1b4   :  { %v703_v27 = vmax.f32 %v688_v24, 0.0 }
 0x1b7   :  { %v661_v23 = vpop.f32.mrf.mxu2 }
 0x1b8   :  { %v662_v25 = vadd.f32 %v661_v23, %v579_v22 }
 0x1ba   :  { %v690_v26 = vadd.f32 %v689_v0, %v662_v25 }
 0x1bc   :  { %v704_v29 = vmax.f32 %v690_v26, 0.0 }
 0x1be   :  { %v709_v2 = vpack.c.bf16 %v704_v29, %v703_v27 }
 0x1bf   :  { %v664_v30 = vpop.f32.mrf.mxu2 }
 0x1c0   :  { %v665_v47 = vadd.f32 %v664_v30, %v584_v18 }
 0x1c2   :  { %v693_v40 = vadd.f32 %v692_v3, %v665_v47 }
 0x1c4   :  { %v705_v33 = vmax.f32 %v693_v40, 0.0 }
 0x1c7   :  { %v666_v35 = vpop.f32.mrf.mxu2 }
 0x1c8   :  { %v667_v38 = vadd.f32 %v666_v35, %v589_v60 }
 0x1ca   :  { %v695_v41 = vadd.f32 %v694_v6, %v667_v38 }
 0x1cc   :  { %v706_v44 = vmax.f32 %v695_v41, 0.0 }
 0x1ce   :  { %v710_v37 = vpack.c.bf16 %v706_v44, %v705_v33 }
 0x1cf   :  { %v669_v39 = vpop.f32.mrf.mxu2 }
 0x1d0   :  { %v670_v28 = vadd.f32 %v669_v39, %v594_v1 }
 0x1d2   :  { %v698_v31 = vadd.f32 %v697_v15, %v670_v28 }
 0x1d4   :  { %v707_v42 = vmax.f32 %v698_v31, 0.0 }
 0x1d6   :  { %v711_v43 = vpack.c.bf16 %v707_v42, %v707_v42 }
 0x1d7   :  { %v671_v34 = vpop.f32.mrf.mxu2 }
 0x1d8   :  { %v725_v45 = vsel %vm723_vm13, %v711_v43, 0 }
 0x1d9   :  { %731 = vmatpush.bf16.msra.mxu3 %v725_v45 }
 0x1dd   :  { %732 = vmatpush.bf16.msra.mxu3 %v710_v37 }
 0x1e1   :  { %733 = vmatpush.bf16.msra.mxu3 %v709_v2 }
 0x1e5   :  { %734 = vmatpush.bf16.msra.mxu3 %v708_v19 }
 0x1e8   :  { %843 = vmatmul.msk.bf16.vlgmr.msra.gmra.mxu3 %vm719_vm14, %v712_v46 }
 0x26b   :  { %v736_v50 = vpop.f32.mrf.mxu3 }
 0x26c   :  { %v737_v32 = vadd.f32 %v736_v50, %v717_v48 }
 0x26e   :  { %v740_v51 = vsub.f32 0.0, %v737_v32  ;;  %v746_v59 = vmax.f32 %v737_v32, 0.0 }
 0x270   :  { %v741_v11 = vmul.f32 1.442695, %v740_v51  ;;  %v747_v55 = vmin.f32 %v746_v59, 1.0 }
 0x272   :  { %863 = vpow2.f32 %v741_v11 }
 0x273   :  { %v738_v52 = vpop.f32.mrf.mxu3 }
 0x278   :  { %v864_v53 = vpop.eup %863 }
 0x279   :  { %v743_v54 = vadd.f32 1.0, %v864_v53 }
 0x27b   :  { %865 = vrcp.f32 %v743_v54 }
 0x281   :  { %v866_v56 = vpop.eup %865 }
 0x282   :  { %v748_v57 = vsel %vm745_vm15, %v747_v55, %v866_v56 }
 0x283   :  { %749 = vst [vmem:[#allocation2] sm:$0x3] %v748_v57 }
 0x284   :  { %760 = dma.vmem_to_hbm [thread:$0]  %s756_s2, 32, %s758_s24, [#allocation3]  }
 0x285   :  { %891 = dma.done.wait [#allocation3], 32  }
 0x286   :  { %892 = vsyncadd [#allocation3], 4294967264 }
 0x287   :  { %765 = vsyncpa [#allocation3], 1 }

</bundles_post_ra>
